<compile_context>
chip_gen: v7x
topology: tpu7x:2x2x1
jax: 0.10.0
libtpu: 0.0.40
codegen_flags: <defaults>
</compile_context>

<pallas_src>
import functools

import jax
import jax.numpy as jnp
from jax.experimental import pallas as pl
from jax.experimental.pallas import tpu as pltpu


def _lora_linear_kernel(x_ref, wt_ref, b_ref, a_ref, bs_ref, o_ref, xa_ref):
    # x_ref:  (tm, K_pad)        activations tile (compute dtype)
    # wt_ref: (K_pad, tn)        transposed Linear weight slab
    # b_ref:  (1, tn)            bias slab (f32)
    # a_ref:  (K_pad, rank)      LoRA A (resident, block index constant)
    # bs_ref: (rank, tn)         LoRA B pre-scaled by alpha
    # o_ref:  (tm, tn)           output tile
    # xa_ref: (tm, rank) f32     VMEM scratch, carried across the j axis
    j = pl.program_id(1)

    @pl.when(j == 0)
    def _():
        # Hoist x @ A: computed once per M tile, reused for every N tile.
        xa_ref[...] = jnp.dot(x_ref[...], a_ref[...],
                              preferred_element_type=jnp.float32)

    base = jnp.dot(x_ref[...], wt_ref[...],
                   preferred_element_type=jnp.float32) + b_ref[...]

    # Cast of xa to the compute dtype loses a couple of mantissa bits when
    # running bf16 -- acceptable for a LoRA correction path (alpha already
    # folded into B, so this is the whole LoRA contribution).
    lora = jnp.dot(xa_ref[...].astype(bs_ref.dtype), bs_ref[...],
                   preferred_element_type=jnp.float32)

    o_ref[...] = (base + lora).astype(o_ref.dtype)


def _round_up(x, m):
    return ((x + m - 1) // m) * m


@functools.partial(jax.jit, static_argnames=("tm", "tn", "compute_dtype"))
def linear_with_lora(x, weight, bias, A, B, alpha, *, tm=256, tn=256,
                     compute_dtype=jnp.bfloat16):
    """x: [batch, seq, in_dim]; weight: [out_dim, in_dim]; bias: [out_dim];
    A: [in_dim, rank]; B: [rank, out_dim]; alpha: scalar."""
    batch, seq, in_dim = x.shape
    out_dim = weight.shape[0]
    rank = A.shape[1]

    M = batch * seq
    # Tile sizes clamped to the (padded) problem size; keep sublane dim a
    # multiple of 16 (bf16 packing) and the lane dim a multiple of 128.
    tm_eff = min(tm, _round_up(M, 16))
    tn_eff = min(tn, _round_up(out_dim, 128))
    M_pad = _round_up(M, tm_eff)
    N_pad = _round_up(out_dim, tn_eff)
    K_pad = _round_up(in_dim, 128)

    x2d = jnp.pad(x.reshape(M, in_dim),
                  ((0, M_pad - M), (0, K_pad - in_dim))).astype(compute_dtype)
    wt = jnp.pad(weight.T,
                 ((0, K_pad - in_dim), (0, N_pad - out_dim))).astype(compute_dtype)
    b2d = jnp.pad(bias, (0, N_pad - out_dim)).reshape(1, N_pad).astype(jnp.float32)
    A_p = jnp.pad(A, ((0, K_pad - in_dim), (0, 0))).astype(compute_dtype)
    # Fold alpha into B once (tiny [rank, out_dim] array) -> plain add epilogue.
    B_p = jnp.pad(B * jnp.asarray(alpha, jnp.float32),
                  ((0, 0), (0, N_pad - out_dim))).astype(compute_dtype)

    grid = (M_pad // tm_eff, N_pad // tn_eff)

    out2d = pl.pallas_call(
        _lora_linear_kernel,
        out_shape=jax.ShapeDtypeStruct((M_pad, N_pad), x.dtype),
        grid_spec=pltpu.PrefetchScalarGridSpec(
            num_scalar_prefetch=0,
            grid=grid,
            in_specs=[
                pl.BlockSpec((tm_eff, K_pad), lambda i, j: (i, 0)),   # x tile (reused over j)
                pl.BlockSpec((K_pad, tn_eff), lambda i, j: (0, j)),   # W^T slab
                pl.BlockSpec((1, tn_eff), lambda i, j: (0, j)),       # bias slab
                pl.BlockSpec((K_pad, rank), lambda i, j: (0, 0)),     # A (resident)
                pl.BlockSpec((rank, tn_eff), lambda i, j: (0, j)),    # alpha*B slab
            ],
            out_specs=pl.BlockSpec((tm_eff, tn_eff), lambda i, j: (i, j)),
            scratch_shapes=[pltpu.VMEM((tm_eff, rank), jnp.float32)],  # hoisted x@A
        ),
        compiler_params=pltpu.CompilerParams(
            # i (M tiles) is parallel -> megacore sharding on v7x.
            # j (N tiles) must stay sequential: the hoisted x@A scratch is
            # carried across it (computed under j == 0).
            dimension_semantics=("parallel", "arbitrary"),
        ),
    )(x2d, wt, b2d, A_p, B_p)

    # TODO(synk): add a K (in_dim) reduction grid axis with a pl.when-managed
    # f32 accumulator if in_dim ever gets too large for a resident (K, tn) slab.
    return out2d[:M, :out_dim].reshape(batch, seq, out_dim)


def _reference(x, weight, bias, A, B, alpha):
    return x @ weight.T + bias + alpha * ((x @ A) @ B)


if __name__ == "__main__":
    key = jax.random.PRNGKey(0)
    k_x, k_w, k_b, k_a, k_bmat = jax.random.split(key, 5)

    # ---- small shapes consistent with the module ----
    batch, seq = 2, 8
    in_dim, out_dim, rank = 32, 32, 4
    alpha = 2.0

    x = jax.random.normal(k_x, (batch, seq, in_dim), dtype=jnp.float32)
    weight = jax.random.normal(k_w, (out_dim, in_dim), dtype=jnp.float32) * 0.05
    bias = jax.random.normal(k_b, (out_dim,), dtype=jnp.float32) * 0.05
    # LoRALayer: A ~ N(0,1)/sqrt(rank); B is zeros at init -- use a random B
    # here so the LoRA matmul path is actually exercised.
    std_dev = 1.0 / jnp.sqrt(jnp.float32(rank))
    A = jax.random.normal(k_a, (in_dim, rank), dtype=jnp.float32) * std_dev
    B = jax.random.normal(k_bmat, (rank, out_dim), dtype=jnp.float32) * 0.1

    ref = _reference(x, weight, bias, A, B, alpha)

    # f32 compute path: tight tolerance.
    out_f32 = linear_with_lora(x, weight, bias, A, B, alpha,
                               compute_dtype=jnp.float32)
    out_f32 = jax.block_until_ready(out_f32)
    assert out_f32.shape == ref.shape
    assert jnp.allclose(out_f32, ref, atol=1e-4, rtol=1e-4), "f32 mismatch"

    # default bf16 compute path (MXU-native): loose tolerance vs f32 reference.
    out_bf16 = linear_with_lora(x, weight, bias, A, B, alpha)
    out_bf16 = jax.block_until_ready(out_bf16)
    assert jnp.allclose(out_bf16, ref, atol=5e-2, rtol=5e-2), "bf16 mismatch"

    # ---- a second, multi-tile check: exercises M padding, N tiling and the
    # hoisted x@A reuse across j tiles. ----
    k2 = jax.random.PRNGKey(1)
    k_x2, k_w2, k_b2, k_a2, k_b2m = jax.random.split(k2, 5)
    b2, s2, in2, out2, r2 = 2, 150, 256, 384, 8   # M=300 (pads), N=384 -> 2 N tiles
    x2 = jax.random.normal(k_x2, (b2, s2, in2), dtype=jnp.float32)
    w2 = jax.random.normal(k_w2, (out2, in2), dtype=jnp.float32) * 0.02
    bi2 = jax.random.normal(k_b2, (out2,), dtype=jnp.float32) * 0.02
    A2 = jax.random.normal(k_a2, (in2, r2), dtype=jnp.float32) / jnp.sqrt(jnp.float32(r2))
    B2 = jax.random.normal(k_b2m, (r2, out2), dtype=jnp.float32) * 0.05

    ref2 = _reference(x2, w2, bi2, A2, B2, alpha)
    out2_f32 = jax.block_until_ready(
        linear_with_lora(x2, w2, bi2, A2, B2, alpha, compute_dtype=jnp.float32))
    assert jnp.allclose(out2_f32, ref2, atol=1e-3, rtol=1e-3), "f32 multi-tile mismatch"
    out2_bf16 = jax.block_until_ready(
        linear_with_lora(x2, w2, bi2, A2, B2, alpha, tn=256, tm=256))
    assert jnp.allclose(out2_bf16, ref2, atol=2e-1, rtol=5e-2), "bf16 multi-tile mismatch"

    print("KERNEL_OK")
</pallas_src>

<mosaic_0001>
module attributes {stable_mosaic.version = 11 : i64} {
  func.func @_lora_linear_kernel(%arg0: i32, %arg1: i32, %arg2: memref<16x128xf32, #tpu.memory_space<vmem>>, %arg3: memref<128x128xf32, #tpu.memory_space<vmem>>, %arg4: memref<1x128xf32, #tpu.memory_space<vmem>>, %arg5: memref<128x4xf32, #tpu.memory_space<vmem>>, %arg6: memref<4x128xf32, #tpu.memory_space<vmem>>, %arg7: memref<16x128xf32, #tpu.memory_space<vmem>>, %arg8: memref<16x4xf32, #tpu.memory_space<vmem>>) attributes {dimension_semantics = [#tpu.dimension_semantics<parallel>, #tpu.dimension_semantics<arbitrary>], iteration_bounds = array<i64: 1, 1>, scalar_prefetch = 0 : i64, scratch_operands = 1 : i64, tpu.core_type = #tpu.core_type<tc>, window_params = [{transform_indices = @transform_0, window_bounds = array<i64: 16, 128>}, {transform_indices = @transform_1, window_bounds = array<i64: 128, 128>}, {transform_indices = @transform_2, window_bounds = array<i64: 1, 128>}, {pipeline_mode = #tpu.pipeline_mode<synchronous>, transform_indices = @transform_3, window_bounds = array<i64: 128, 4>}, {transform_indices = @transform_4, window_bounds = array<i64: 4, 128>}, {transform_indices = @transform_5, window_bounds = array<i64: 16, 128>}]} {
    %c0_i32 = arith.constant 0 : i32
    %0 = arith.cmpi eq, %arg1, %c0_i32 : i32
    %1 = arith.extui %0 : i1 to i32
    %c0_i32_0 = arith.constant 0 : i32
    %2 = arith.cmpi ne, %1, %c0_i32_0 : i32
    scf.if %2 {
      %c0_13 = arith.constant 0 : index
      %c0_14 = arith.constant 0 : index
      %14 = vector.load %arg2[%c0_13, %c0_14] : memref<16x128xf32, #tpu.memory_space<vmem>>, vector<16x128xf32>
      %c0_15 = arith.constant 0 : index
      %c0_16 = arith.constant 0 : index
      %15 = vector.load %arg5[%c0_15, %c0_16] : memref<128x4xf32, #tpu.memory_space<vmem>>, vector<128x4xf32>
      %cst_17 = arith.constant dense<0.000000e+00> : vector<16x4xf32>
      %16 = tpu.matmul %14, %15, %cst_17 {dimension_numbers = #tpu.dot_dimension_numbers<[1], [0], [0], [1], [0, 0, 1, 1], [], []>} : vector<16x128xf32>, vector<128x4xf32>, vector<16x4xf32> -> vector<16x4xf32>
      %c0_18 = arith.constant 0 : index
      %c0_19 = arith.constant 0 : index
      %17 = vector.load %arg8[%c0_18, %c0_19] : memref<16x4xf32, #tpu.memory_space<vmem>>, vector<16x4xf32>
      tpu.vector_store %arg8[%c0_18, %c0_19], %16 {strides = array<i32>} : memref<16x4xf32, #tpu.memory_space<vmem>>, vector<16x4xf32>,
    } else {
    }
    %c0 = arith.constant 0 : index
    %c0_1 = arith.constant 0 : index
    %3 = vector.load %arg2[%c0, %c0_1] : memref<16x128xf32, #tpu.memory_space<vmem>>, vector<16x128xf32>
    %c0_2 = arith.constant 0 : index
    %c0_3 = arith.constant 0 : index
    %4 = vector.load %arg3[%c0_2, %c0_3] : memref<128x128xf32, #tpu.memory_space<vmem>>, vector<128x128xf32>
    %cst = arith.constant dense<0.000000e+00> : vector<16x128xf32>
    %5 = tpu.matmul %3, %4, %cst {dimension_numbers = #tpu.dot_dimension_numbers<[1], [0], [0], [1], [0, 0, 1, 1], [], []>} : vector<16x128xf32>, vector<128x128xf32>, vector<16x128xf32> -> vector<16x128xf32>
    %c0_4 = arith.constant 0 : index
    %c0_5 = arith.constant 0 : index
    %6 = vector.load %arg4[%c0_4, %c0_5] : memref<1x128xf32, #tpu.memory_space<vmem>>, vector<1x128xf32>
    %7 = vector.broadcast %6 : vector<1x128xf32> to vector<16x128xf32>
    %8 = arith.addf %5, %7 : vector<16x128xf32>
    %c0_6 = arith.constant 0 : index
    %c0_7 = arith.constant 0 : index
    %9 = vector.load %arg8[%c0_6, %c0_7] : memref<16x4xf32, #tpu.memory_space<vmem>>, vector<16x4xf32>
    %c0_8 = arith.constant 0 : index
    %c0_9 = arith.constant 0 : index
    %10 = vector.load %arg6[%c0_8, %c0_9] : memref<4x128xf32, #tpu.memory_space<vmem>>, vector<4x128xf32>
    %cst_10 = arith.constant dense<0.000000e+00> : vector<16x128xf32>
    %11 = tpu.matmul %9, %10, %cst_10 {dimension_numbers = #tpu.dot_dimension_numbers<[1], [0], [0], [1], [0, 0, 1, 1], [], []>} : vector<16x4xf32>, vector<4x128xf32>, vector<16x128xf32> -> vector<16x128xf32>
    %12 = arith.addf %8, %11 : vector<16x128xf32>
    %c0_11 = arith.constant 0 : index
    %c0_12 = arith.constant 0 : index
    %13 = vector.load %arg7[%c0_11, %c0_12] : memref<16x128xf32, #tpu.memory_space<vmem>>, vector<16x128xf32>
    tpu.vector_store %arg7[%c0_11, %c0_12], %12 {strides = array<i32>} : memref<16x128xf32, #tpu.memory_space<vmem>>, vector<16x128xf32>,
    return
  }
  func.func @transform_0(%arg0: i32, %arg1: i32) -> (i32, i32) {
    %c0_i32 = arith.constant 0 : i32
    %c0_i32_0 = arith.constant 0 : i32
    return %arg0, %c0_i32 : i32, i32
  }
  func.func @transform_1(%arg0: i32, %arg1: i32) -> (i32, i32) {
    %c0_i32 = arith.constant 0 : i32
    %c0_i32_0 = arith.constant 0 : i32
    return %c0_i32, %arg1 : i32, i32
  }
  func.func @transform_2(%arg0: i32, %arg1: i32) -> (i32, i32) {
    %c0_i32 = arith.constant 0 : i32
    %c0_i32_0 = arith.constant 0 : i32
    return %c0_i32, %arg1 : i32, i32
  }
  func.func @transform_3(%arg0: i32, %arg1: i32) -> (i32, i32) {
    %c0_i32 = arith.constant 0 : i32
    %c0_i32_0 = arith.constant 0 : i32
    %c0_i32_1 = arith.constant 0 : i32
    return %c0_i32, %c0_i32_0 : i32, i32
  }
  func.func @transform_4(%arg0: i32, %arg1: i32) -> (i32, i32) {
    %c0_i32 = arith.constant 0 : i32
    %c0_i32_0 = arith.constant 0 : i32
    return %c0_i32, %arg1 : i32, i32
  }
  func.func @transform_5(%arg0: i32, %arg1: i32) -> (i32, i32) {
    %c0_i32 = arith.constant 0 : i32
    return %arg0, %arg1 : i32, i32
  }
}

</mosaic_0001>

<bundles_post_ra>
// kernel: linear_with_lora.1
= control target key start
LH: loop header
LB: loop body
LE: loop exit
PB: predicated region body
PF: predicated region fallthrough
CT: control target
= control target key end

     0   :  { %vm230_vm0 = vcmask 1043456   ;;  %vm117_vm1 = vcmask 31744   ;;  %s647_s3 = inlined_call_operand.vmem [shape: f32[128,4], index: 3, kind: input, shape index: {}]   ;;  %s648_s0 = inlined_call_operand.vmem [shape: f32[16,128], index: 0, kind: input, shape index: {}]   ;;  %s649_s1 = inlined_call_operand.vmem [shape: f32[128,128], index: 1, kind: input, shape index: {}]   ;;  %s650_s4 = inlined_call_operand.vmem [shape: f32[4,128], index: 4, kind: input, shape index: {}]   ;;  %s651_s2 = inlined_call_operand.vmem [shape: f32[1,128], index: 2, kind: input, shape index: {}]   ;;  %s652_s5 = inlined_call_operand.vmem [shape: f32[16,128], index: 5, kind: output, shape index: {}]  }
   0x1   :  { %v26_v0 = vld [vmem:[%s647_s3] sm:$0xff]  ;;  %v27_v1 = vld [vmem:[%s647_s3 + $0x8] sm:$0xff]  ;;  %v28_v2 = vld [vmem:[%s647_s3 + $0x10] sm:$0xff] }
   0x2   :  { %v435_v3 = vpack.c.bf16 %v27_v1, %v26_v0  ;;  %v29_v4 = vld [vmem:[%s647_s3 + $0x18] sm:$0xff]  ;;  %v30_v6 = vld [vmem:[%s647_s3 + $0x20] sm:$0xff]  ;;  %v31_v7 = vld [vmem:[%s647_s3 + $0x28] sm:$0xff] }
   0x3   :  { %v439_v5 = vpack.c.bf16 %v29_v4, %v28_v2  ;;  %v443_v8 = vpack.c.bf16 %v31_v7, %v30_v6  ;;  %v32_v9 = vld [vmem:[%s647_s3 + $0x30] sm:$0xff]  ;;  %v33_v10 = vld [vmem:[%s647_s3 + $0x38] sm:$0xff]  ;;  %v24_v11 = vld [vmem:[%s648_s0] sm:$0xff] }
   0x4   :  { %436 = vmatprep.subr.bf16.mxu0 %v435_v3  ;;  %392 = vmatprep.mubr.f32.mxu0 %v24_v11  ;;  %v122_v12 = vld [vmem:[%s649_s1] sm:$0xff]  ;;  %v123_v13 = vld [vmem:[%s649_s1 + $0x8] sm:$0xff]  ;;  %v124_v14 = vld [vmem:[%s649_s1 + $0x10] sm:$0xff]  ;;  %v447_v20 = vpack.c.bf16 %v33_v10, %v32_v9 }
   0x5   :  { %438 = vmatpush3.bf16.msra.mxu0 %v435_v3  ;;  %427 = vmatprep.mubr.f32.mxu1 %v24_v11  ;;  %v467_v15 = vpack.c.bf16 %v123_v13, %v122_v12  ;;  %v125_v16 = vld [vmem:[%s649_s1 + $0x18] sm:$0xff]  ;;  %v126_v18 = vld [vmem:[%s649_s1 + $0x20] sm:$0xff]  ;;  %v127_v19 = vld [vmem:[%s649_s1 + $0x28] sm:$0xff] }
   0x6   :  { %440 = vmatprep.subr.bf16.mxu0 %v439_v5  ;;  %v471_v17 = vpack.c.bf16 %v125_v16, %v124_v14  ;;  %v34_v21 = vld [vmem:[%s647_s3 + $0x40] sm:$0xff]  ;;  %v35_v22 = vld [vmem:[%s647_s3 + $0x48] sm:$0xff]  ;;  %v475_v23 = vpack.c.bf16 %v127_v19, %v126_v18  ;;  %v128_v24 = vld [vmem:[%s649_s1 + $0x30] sm:$0xff] }
   0x7   :  { %468 = vmatprep.subr.bf16.mxu1 %v467_v15  ;;  %v129_v25 = vld [vmem:[%s649_s1 + $0x38] sm:$0xff]  ;;  %v451_v26 = vpack.c.bf16 %v35_v22, %v34_v21  ;;  %v36_v27 = vld [vmem:[%s647_s3 + $0x50] sm:$0xff]  ;;  %v130_v30 = vld [vmem:[%s649_s1 + $0x40] sm:$0xff] }
   0x8   :  { %470 = vmatpush3.bf16.msra.mxu1 %v467_v15  ;;  %v37_v28 = vld [vmem:[%s647_s3 + $0x58] sm:$0xff]  ;;  %v479_v29 = vpack.c.bf16 %v129_v25, %v128_v24  ;;  %v131_v31 = vld [vmem:[%s649_s1 + $0x48] sm:$0xff]  ;;  %v38_v33 = vld [vmem:[%s647_s3 + $0x60] sm:$0xff] }
   0x9   :  { %442 = vmatpush3.bf16.msra.mxu0 %v439_v5  ;;  %472 = vmatprep.subr.bf16.mxu1 %v471_v17  ;;  %v455_v32 = vpack.c.bf16 %v37_v28, %v36_v27  ;;  %v39_v34 = vld [vmem:[%s647_s3 + $0x68] sm:$0xff]  ;;  %v483_v35 = vpack.c.bf16 %v131_v31, %v130_v30  ;;  %v132_v36 = vld [vmem:[%s649_s1 + $0x50] sm:$0xff]  ;;  %v133_v37 = vld [vmem:[%s649_s1 + $0x58] sm:$0xff] }
   0xa   :  { %444 = vmatprep.subr.bf16.mxu0 %v443_v8  ;;  %v459_v38 = vpack.c.bf16 %v39_v34, %v38_v33  ;;  %v40_v39 = vld [vmem:[%s647_s3 + $0x70] sm:$0xff]  ;;  %v41_v40 = vld [vmem:[%s647_s3 + $0x78] sm:$0xff]  ;;  %v487_v41 = vpack.c.bf16 %v133_v37, %v132_v36  ;;  %v134_v42 = vld [vmem:[%s649_s1 + $0x60] sm:$0xff] }
   0xb   :  { %v135_v43 = vld [vmem:[%s649_s1 + $0x68] sm:$0xff]  ;;  %v463_v44 = vpack.c.bf16 %v41_v40, %v40_v39  ;;  %v136_v46 = vld [vmem:[%s649_s1 + $0x70] sm:$0xff]  ;;  %v137_v47 = vld [vmem:[%s649_s1 + $0x78] sm:$0xff] }
   0xc   :  { %474 = vmatpush3.bf16.msra.mxu1 %v471_v17  ;;  %v491_v45 = vpack.c.bf16 %v135_v43, %v134_v42  ;;  %v495_v48 = vpack.c.bf16 %v137_v47, %v136_v46  ;;  %v25_v49 = vld [vmem:[%s648_s0 + $0x8] sm:$0xff]  ;;  %v222_v50 = vld [vmem:[%s650_s4] sm:$0xf] }
   0xd   :  { %446 = vmatpush3.bf16.msra.mxu0 %v443_v8  ;;  %476 = vmatprep.subr.bf16.mxu1 %v475_v23  ;;  %v317_v55 = vld [vmem:[%s651_s2] ss:$0 sm:$0xff] }
   0xe   :  { %448 = vmatprep.subr.bf16.mxu0 %v447_v20 }
  0x10   :  { %478 = vmatpush3.bf16.msra.mxu1 %v475_v23 }
  0x11   :  { %450 = vmatpush3.bf16.msra.mxu0 %v447_v20  ;;  %480 = vmatprep.subr.bf16.mxu1 %v479_v29 }
  0x12   :  { %452 = vmatprep.subr.bf16.mxu0 %v451_v26 }
  0x14   :  { %482 = vmatpush3.bf16.msra.mxu1 %v479_v29 }
  0x15   :  { %454 = vmatpush3.bf16.msra.mxu0 %v451_v26  ;;  %484 = vmatprep.subr.bf16.mxu1 %v483_v35 }
  0x16   :  { %456 = vmatprep.subr.bf16.mxu0 %v455_v32 }
  0x18   :  { %486 = vmatpush3.bf16.msra.mxu1 %v483_v35 }
  0x19   :  { %458 = vmatpush3.bf16.msra.mxu0 %v455_v32  ;;  %488 = vmatprep.subr.bf16.mxu1 %v487_v41 }
  0x1a   :  { %460 = vmatprep.subr.bf16.mxu0 %v459_v38 }
  0x1c   :  { %490 = vmatpush3.bf16.msra.mxu1 %v487_v41 }
  0x1d   :  { %462 = vmatpush3.bf16.msra.mxu0 %v459_v38  ;;  %492 = vmatprep.subr.bf16.mxu1 %v491_v45 }
  0x1e   :  { %464 = vmatprep.subr.bf16.mxu0 %v463_v44 }
  0x20   :  { %494 = vmatpush3.bf16.msra.mxu1 %v491_v45 }
  0x21   :  { %466 = vmatpush3.bf16.msra.mxu0 %v463_v44  ;;  %496 = vmatprep.subr.bf16.mxu1 %v495_v48 }
  0x24   :  { %393 = vmatmul.mubr.f32.vlgmr.msra.gmra.mrb[0].mxu0 %v25_v49  ;;  %498 = vmatpush3.bf16.msra.mxu1 %v495_v48 }
  0x25   :  { %430 = vmatprep.subr.msk.mxu1 %vm230_vm0, %v222_v50 }
  0x27   :  { %428 = vmatmul.mubr.f32.vlgmr.msra.gmra.mrb[0].mxu1 %v25_v49 }
  0x28   :  { %431 = vmatpush3.msk.msra.mxu1 %vm230_vm0, %v222_v50 }
  0xf7   :  { %v394_v51 = vpop.f32.mrb[0].mxu0 }
  0xf8   :  { %119 = vst.msk [vmem:[#allocation2 + $0x8] sm:$0xff] %vm117_vm1, %v394_v51  ;;  %v108_v52 = vpop.f32.mrb[1].mxu0 }
  0xf9   :  { %118 = vst.msk [vmem:[#allocation2] sm:$0xff] %vm117_vm1, %v108_v52 }
  0xff   :  { %v221_v54 = vld [vmem:[#allocation2 + $0x8] sm:$0xff] }
 0x100   :  { %v220_v53 = vld [vmem:[#allocation2] sm:$0xff] }
 0x101   :  { %432 = vmatprep.mubr.msk.f32.mxu1 %vm117_vm1, %v220_v53 }
 0x102   :  { %433 = vmatmul.mubr.msk.f32.vlgmr.msra.gmra.mrb[0].mxu1 %vm117_vm1, %v221_v54 }
 0x1d5   :  { %v434_v56 = vpop.f32.mrb[0].mxu1 }
 0x1d6   :  { %v499_v57 = vadd.f32 %v434_v56, %v317_v55  ;;  %v300_v58 = vpop.f32.mrb[1].mxu1 }
 0x1d7   :  { %v500_v59 = vadd.f32 %v317_v55, %v300_v58 }
 0x1d8   :  { %312 = vst [vmem:[%s652_s5 + $0x8] sm:$0xff] %v499_v57 }
 0x1d9   :  { %311 = vst [vmem:[%s652_s5] sm:$0xff] %v500_v59 }

</bundles_post_ra>
